<compile_context>
chip_gen: v7x
topology: tpu7x:2x2x1
jax: 0.10.0
libtpu: 0.0.40
codegen_flags: <defaults>
</compile_context>

<pallas_src>
import jax
import jax.numpy as jnp
from jax.experimental import pallas as pl
from jax.experimental.pallas import tpu as pltpu

INPUT_SIZE = 784
NUM_CLASSES = 10
MAX_BATCH_TILE = 4096          # bf16 x rows per grid step (~19 MiB pipelined)


def _round_up(n, m):
    return ((n + m - 1) // m) * m


def _choose_batch_tile(batch):
    # Aim for >= 4 grid steps (keeps both v7x TensorCores fed and the DMA
    # pipeline busy), tile rows a multiple of 16 (bf16 sublane packing),
    # capped so the double-buffered footprint fits VMEM on every generation.
    tb = _round_up(pl.cdiv(batch, 4), 16)
    return max(16, min(MAX_BATCH_TILE, tb))


def linear_kernel(x_ref, wt_ref, b_ref, o_ref):
    # x_ref : (tb, 784)  bf16  -- streamed (double-buffered)
    # wt_ref: (784, 10)  bf16  -- VMEM-resident, single-buffered
    # b_ref : (1, 10)    f32   -- VMEM-resident, single-buffered
    # o_ref : (tb, 10)   f32
    acc = jnp.dot(x_ref[...], wt_ref[...], preferred_element_type=jnp.float32)
    o_ref[...] = (acc + b_ref[...]).astype(o_ref.dtype)


def logistic_regression_forward(x, weight, bias):
    """x: (B, 784), weight: (10, 784), bias: (10,) -> (B, 10) f32."""
    batch = x.shape[0]

    # Wrapper-boundary plumbing (plain JAX): bf16 operands for the HBM-bound
    # stream, f32 bias so the add happens on the f32 accumulator.
    # TODO(synk): in a real pipeline the caller should hand us bf16 x directly
    #             so this cast fuses upstream instead of costing an HBM pass.
    x_bf16 = x.astype(jnp.bfloat16)
    wt = weight.T.astype(jnp.bfloat16)                       # (784, 10)
    b2d = bias.reshape(1, NUM_CLASSES).astype(jnp.float32)   # (1, 10)

    tb = _choose_batch_tile(batch)
    grid = (pl.cdiv(batch, tb),)

    out = pl.pallas_call(
        linear_kernel,
        out_shape=jax.ShapeDtypeStruct((batch, NUM_CLASSES), jnp.float32),
        grid_spec=pltpu.PrefetchScalarGridSpec(
            num_scalar_prefetch=0,
            grid=grid,
            in_specs=[
                # x: streamed, one batch tile per grid step (ragged last block OK).
                pl.BlockSpec((tb, INPUT_SIZE), lambda i: (i, 0)),
                # weight / bias: constant index_map -> resident; single buffer.
                pl.BlockSpec((INPUT_SIZE, NUM_CLASSES), lambda i: (0, 0),
                             pipeline_mode=pl.Buffered(1)),
                pl.BlockSpec((1, NUM_CLASSES), lambda i: (0, 0),
                             pipeline_mode=pl.Buffered(1)),
            ],
            out_specs=pl.BlockSpec((tb, NUM_CLASSES), lambda i: (i, 0)),
        ),
        compiler_params=pltpu.CompilerParams(
            dimension_semantics=("parallel",),   # megacore-shard the batch loop
            vmem_limit_bytes=48 * 1024 * 1024,   # headroom for tb=4096 bf16 tiles
        ),
        cost_estimate=pl.CostEstimate(
            flops=2 * batch * INPUT_SIZE * NUM_CLASSES,
            transcendentals=0,
            bytes_accessed=(
                batch * INPUT_SIZE * 2            # x (bf16)
                + INPUT_SIZE * NUM_CLASSES * 2    # W^T (bf16)
                + NUM_CLASSES * 4                 # bias (f32)
                + batch * NUM_CLASSES * 4         # out (f32)
            ),
        ),
    )(x_bf16, wt, b2d)

    return out


if __name__ == "__main__":
    key = jax.random.PRNGKey(0)
    kx, kw, kb = jax.random.split(key, 3)

    B = 8
    x = jax.random.normal(kx, (B, INPUT_SIZE), dtype=jnp.float32)

    # Deterministic parameter init (mimics nn.Linear uniform(-1/sqrt(fan_in), 1/sqrt(fan_in)))
    bound = 1.0 / (INPUT_SIZE ** 0.5)
    weight = jax.random.uniform(
        kw, (NUM_CLASSES, INPUT_SIZE), dtype=jnp.float32, minval=-bound, maxval=bound
    )
    bias = jax.random.uniform(
        kb, (NUM_CLASSES,), dtype=jnp.float32, minval=-bound, maxval=bound
    )

    out = logistic_regression_forward(x, weight, bias)
    out = jax.block_until_ready(out)

    # Reference check against plain JAX (bf16 operands -> looser tolerance).
    ref = x @ weight.T + bias
    assert out.shape == (B, NUM_CLASSES)
    assert jnp.allclose(out, ref, atol=2e-2, rtol=2e-2), (
        f"max abs err {jnp.max(jnp.abs(out - ref))}"
    )

    print("KERNEL_OK")
</pallas_src>

<mosaic_0001>
module attributes {stable_mosaic.version = 11 : i64} {
  func.func @linear_kernel(%arg0: i32, %arg1: memref<16x784xbf16, #tpu.memory_space<vmem>>, %arg2: memref<784x10xbf16, #tpu.memory_space<vmem>>, %arg3: memref<1x10xf32, #tpu.memory_space<vmem>>, %arg4: memref<16x10xf32, #tpu.memory_space<vmem>>) attributes {dimension_semantics = [#tpu.dimension_semantics<parallel>], iteration_bounds = array<i64: 1>, scalar_prefetch = 0 : i64, scratch_operands = 0 : i64, tpu.core_type = #tpu.core_type<tc>, window_params = [{transform_indices = @transform_0, window_bounds = array<i64: 16, 784>}, {pipeline_mode = #tpu.pipeline_mode<synchronous>, transform_indices = @transform_1, window_bounds = array<i64: 784, 10>}, {pipeline_mode = #tpu.pipeline_mode<synchronous>, transform_indices = @transform_2, window_bounds = array<i64: 1, 10>}, {transform_indices = @transform_3, window_bounds = array<i64: 16, 10>}]} {
    %c0 = arith.constant 0 : index
    %c0_0 = arith.constant 0 : index
    %0 = vector.load %arg1[%c0, %c0_0] : memref<16x784xbf16, #tpu.memory_space<vmem>>, vector<16x784xbf16>
    %c0_1 = arith.constant 0 : index
    %c0_2 = arith.constant 0 : index
    %1 = vector.load %arg2[%c0_1, %c0_2] : memref<784x10xbf16, #tpu.memory_space<vmem>>, vector<784x10xbf16>
    %cst = arith.constant dense<0.000000e+00> : vector<16x10xf32>
    %2 = tpu.matmul %0, %1, %cst {dimension_numbers = #tpu.dot_dimension_numbers<[1], [0], [0], [1], [0, 0, 1, 1], [], []>} : vector<16x784xbf16>, vector<784x10xbf16>, vector<16x10xf32> -> vector<16x10xf32>
    %c0_3 = arith.constant 0 : index
    %c0_4 = arith.constant 0 : index
    %3 = vector.load %arg3[%c0_3, %c0_4] : memref<1x10xf32, #tpu.memory_space<vmem>>, vector<1x10xf32>
    %4 = vector.broadcast %3 : vector<1x10xf32> to vector<16x10xf32>
    %5 = arith.addf %2, %4 : vector<16x10xf32>
    %c0_5 = arith.constant 0 : index
    %c0_6 = arith.constant 0 : index
    %6 = vector.load %arg4[%c0_5, %c0_6] : memref<16x10xf32, #tpu.memory_space<vmem>>, vector<16x10xf32>
    tpu.vector_store %arg4[%c0_5, %c0_6], %5 {strides = array<i32>} : memref<16x10xf32, #tpu.memory_space<vmem>>, vector<16x10xf32>,
    return
  }
  func.func @transform_0(%arg0: i32) -> (i32, i32) {
    %c0_i32 = arith.constant 0 : i32
    %c0_i32_0 = arith.constant 0 : i32
    return %arg0, %c0_i32 : i32, i32
  }
  func.func @transform_1(%arg0: i32) -> (i32, i32) {
    %c0_i32 = arith.constant 0 : i32
    %c0_i32_0 = arith.constant 0 : i32
    %c0_i32_1 = arith.constant 0 : i32
    return %c0_i32, %c0_i32_0 : i32, i32
  }
  func.func @transform_2(%arg0: i32) -> (i32, i32) {
    %c0_i32 = arith.constant 0 : i32
    %c0_i32_0 = arith.constant 0 : i32
    %c0_i32_1 = arith.constant 0 : i32
    return %c0_i32, %c0_i32_0 : i32, i32
  }
  func.func @transform_3(%arg0: i32) -> (i32, i32) {
    %c0_i32 = arith.constant 0 : i32
    %c0_i32_0 = arith.constant 0 : i32
    return %arg0, %c0_i32 : i32, i32
  }
}

</mosaic_0001>

<bundles_post_ra>
// kernel: tpu_custom_call.1
= control target key start
LH: loop header
LB: loop body
LE: loop exit
PB: predicated region body
PF: predicated region fallthrough
CT: control target
= control target key end

     0   :  { %8 = vsyncpa [#allocation3], 0  ;;  %v865_v38 = vmov 0.0   ;;  %vm866_vm0 = vmmov 0   ;;  %vm458_vm1 = vcmask 130048   ;;  %vm626_vm2 = vcmask 80896   ;;  %s1073_s0 = inlined_call_operand.vmem [shape: bf16[8,784], index: 0, kind: input, shape index: {}]   ;;  %s1074_s1 = inlined_call_operand.vmem [shape: bf16[784,10], index: 1, kind: input, shape index: {}]   ;;  %s1075_s2 = inlined_call_operand.vmem [shape: f32[1,10], index: 2, kind: input, shape index: {}]   ;;  %s1076_s3 = inlined_call_operand.hbm [shape: f32[8,10], index: 3, kind: output, shape index: {}]  }
   0x1   :  { %v782_v0 = vld [vmem:[%s1074_s1 + $0x40] sm:$0xff]   ;;  %v786_v4 = vld [vmem:[%s1074_s1 + $0x48] sm:$0xff]   ;;  %v790_v8 = vld [vmem:[%s1074_s1 + $0x50] sm:$0xff]  }
   0x2   :  { %v783_v1 = vld [vmem:[%s1074_s1] sm:$0xff]   ;;  %703 = vmatprep.subr.bf16.mxu0 %v782_v0  ;;  %v787_v5 = vld [vmem:[%s1074_s1 + $0x8] sm:$0xff]   ;;  %v791_v9 = vld [vmem:[%s1074_s1 + $0x10] sm:$0xff]  }
   0x3   :  { %v784_v2 = vld [vmem:[%s1074_s1 + $0xc0] sm:$0xff]   ;;  %704 = vmatpush3.bf16.msra.mxu0 %v783_v1  ;;  %v788_v6 = vld [vmem:[%s1074_s1 + $0xc8] sm:$0xff]   ;;  %v792_v10 = vld [vmem:[%s1074_s1 + $0xd0] sm:$0xff]  }
   0x4   :  { %v785_v3 = vld [vmem:[%s1074_s1 + $0x80] sm:$0xff]   ;;  %725 = vmatprep.subr.bf16.mxu1 %v784_v2  ;;  %705 = vmatprep.subr.bf16.mxu0 %v786_v4  ;;  %v789_v7 = vld [vmem:[%s1074_s1 + $0x88] sm:$0xff]   ;;  %v793_v11 = vld [vmem:[%s1074_s1 + $0x90] sm:$0xff]  }
   0x5   :  { %726 = vmatpush3.bf16.msra.mxu1 %v785_v3  ;;  %v794_v12 = vld [vmem:[%s1074_s1 + $0x58] sm:$0xff]   ;;  %v798_v16 = vld [vmem:[%s1074_s1 + $0x60] sm:$0xff]   ;;  %v802_v20 = vld [vmem:[%s1074_s1 + $0x68] sm:$0xff]  }
   0x6   :  { %727 = vmatprep.subr.bf16.mxu1 %v788_v6  ;;  %v795_v13 = vld [vmem:[%s1074_s1 + $0x18] sm:$0xff]   ;;  %v799_v17 = vld [vmem:[%s1074_s1 + $0x20] sm:$0xff]   ;;  %v803_v21 = vld [vmem:[%s1074_s1 + $0x28] sm:$0xff]  }
   0x7   :  { %706 = vmatpush3.bf16.msra.mxu0 %v787_v5  ;;  %v796_v14 = vld [vmem:[%s1074_s1 + $0xd8] sm:$0xff]   ;;  %v800_v18 = vld [vmem:[%s1074_s1 + $0xe0] sm:$0xff]   ;;  %v804_v22 = vld [vmem:[%s1074_s1 + $0xe8] sm:$0xff]  }
   0x8   :  { %707 = vmatprep.subr.bf16.mxu0 %v790_v8  ;;  %v797_v15 = vld [vmem:[%s1074_s1 + $0x98] sm:$0xff]   ;;  %v801_v19 = vld [vmem:[%s1074_s1 + $0xa0] sm:$0xff]   ;;  %v805_v23 = vld [vmem:[%s1074_s1 + $0xa8] sm:$0xff]  }
   0x9   :  { %728 = vmatpush3.bf16.msra.mxu1 %v789_v7  ;;  %v806_v24 = vld [vmem:[%s1074_s1 + $0x70] sm:$0xff]   ;;  %v810_v28 = vld [vmem:[%s1074_s1 + $0x78] sm:$0xff]   ;;  %v815_v32 = vld [vmem:[%s1073_s0 + $0x4] ss:$28 sps:$4 sm:$0xff]  }
   0xa   :  { %729 = vmatprep.subr.bf16.mxu1 %v792_v10  ;;  %v807_v25 = vld [vmem:[%s1074_s1 + $0x30] sm:$0xff]   ;;  %v811_v29 = vld [vmem:[%s1074_s1 + $0x38] sm:$0xff]   ;;  %494 = vmatprep.mubr.bf16.mxu0 %v815_v32  ;;  %v817_v34 = vld [vmem:[%s1074_s1 + $0x140] sm:$0xff]  }
   0xb   :  { %708 = vmatpush3.bf16.msra.mxu0 %v791_v9  ;;  %v808_v26 = vld [vmem:[%s1074_s1 + $0xf0] sm:$0xff]   ;;  %v812_v30 = vld [vmem:[%s1074_s1 + $0xf8] sm:$0xff]   ;;  %v818_v35 = vld [vmem:[%s1073_s0 + $0x8] ss:$28 sps:$4 sm:$0xff]  }
   0xc   :  { %709 = vmatprep.subr.bf16.mxu0 %v794_v12  ;;  %v809_v27 = vld [vmem:[%s1074_s1 + $0xb0] sm:$0xff]   ;;  %v813_v31 = vld [vmem:[%s1073_s0] ss:$28 sps:$4 sm:$0xff]   ;;  %v820_v36 = vld [vmem:[%s1073_s0 + $0xc] ss:$28 sps:$4 sm:$0xff]  }
   0xd   :  { %730 = vmatpush3.bf16.msra.mxu1 %v793_v11  ;;  %v816_v33 = vld [vmem:[%s1074_s1 + $0xb8] sm:$0xff]   ;;  %v821_v37 = vld [vmem:[%s1074_s1 + $0x100] sm:$0xff]   ;;  %535 = vmatprep.mubr.bf16.mxu1 %v820_v36  ;;  %v822_v39 = vld [vmem:[%s1074_s1 + $0x148] sm:$0xff]  }
   0xe   :  { %731 = vmatprep.subr.bf16.mxu1 %v796_v14  ;;  %v823_v40 = vld [vmem:[%s1074_s1 + $0x108] sm:$0xff]   ;;  %v824_v41 = vld [vmem:[%s1074_s1 + $0x150] sm:$0xff]   ;;  %v826_v43 = vld [vmem:[%s1074_s1 + $0x158] sm:$0xff]  }
   0xf   :  { %710 = vmatpush3.bf16.msra.mxu0 %v795_v13  ;;  %v825_v42 = vld [vmem:[%s1074_s1 + $0x110] sm:$0xff]   ;;  %v827_v44 = vld [vmem:[%s1074_s1 + $0x118] sm:$0xff]   ;;  %v828_v45 = vld [vmem:[%s1074_s1 + $0x160] sm:$0xff]  }
  0x10   :  { %711 = vmatprep.subr.bf16.mxu0 %v798_v16  ;;  %v829_v46 = vld [vmem:[%s1074_s1 + $0x120] sm:$0xff]   ;;  %v830_v47 = vld [vmem:[%s1074_s1 + $0x168] sm:$0xff]   ;;  %v839_v49 = vld [vmem:[%s1073_s0 + $0x14] ss:$28 sps:$4 sm:$0xff]  }
  0x11   :  { %732 = vmatpush3.bf16.msra.mxu1 %v797_v15  ;;  %v836_v48 = vld [vmem:[%s1074_s1 + $0x180] sm:$0xff]   ;;  %v831_v50 = vld [vmem:[%s1074_s1 + $0x128] sm:$0xff]   ;;  %v840_v51 = vld [vmem:[%s1073_s0 + $0x18] ss:$28 sps:$4 sm:$0xff]  }
  0x12   :  { %733 = vmatprep.subr.bf16.mxu1 %v800_v18  ;;  %v832_v52 = vld [vmem:[%s1074_s1 + $0x170] sm:$0xff]   ;;  %v834_v54 = vld [vmem:[%s1074_s1 + $0x178] sm:$0xff]   ;;  %v645_v58 = vld [vmem:[%s1075_s2] ss:$0 sm:$0xff] }
  0x13   :  { %712 = vmatpush3.bf16.msra.mxu0 %v799_v17  ;;  %v833_v53 = vld [vmem:[%s1074_s1 + $0x130] sm:$0xff]   ;;  %v835_v55 = vld [vmem:[%s1074_s1 + $0x138] sm:$0xff]  }
  0x14   :  { %713 = vmatprep.subr.bf16.mxu0 %v802_v20  ;;  %v837_v56 = vld [vmem:[%s1073_s0 + $0x10] ss:$28 sps:$4 sm:$0xff]  }
  0x15   :  { %734 = vmatpush3.bf16.msra.mxu1 %v801_v19 }
  0x16   :  { %735 = vmatprep.subr.bf16.mxu1 %v804_v22 }
  0x17   :  { %714 = vmatpush3.bf16.msra.mxu0 %v803_v21 }
  0x18   :  { %715 = vmatprep.subr.bf16.mxu0 %v806_v24 }
  0x19   :  { %736 = vmatpush3.bf16.msra.mxu1 %v805_v23 }
  0x1a   :  { %737 = vmatprep.subr.bf16.mxu1 %v808_v26 }
  0x1b   :  { %716 = vmatpush3.bf16.msra.mxu0 %v807_v25 }
  0x1c   :  { %717 = vmatprep.subr.bf16.mxu0 %v810_v28 }
  0x1d   :  { %738 = vmatpush3.bf16.msra.mxu1 %v809_v27 }
  0x1e   :  { %739 = vmatprep.subr.bf16.mxu1 %v812_v30 }
  0x1f   :  { %718 = vmatpush3.bf16.msra.mxu0 %v811_v29 }
  0x20   :  { %747 = vmatprep.subr.bf16.mxu0 %v817_v34 }
  0x21   :  { %740 = vmatpush3.bf16.msra.mxu1 %v816_v33 }
  0x22   :  { %495 = vmatmul.mubr.bf16.vlgmr.msra.gmra.mrb[0].mxu0 %v813_v31  ;;  %771 = vmatprep.subr.bf16.mxu1 %v865_v38 }
  0x23   :  { %748 = vmatpush3.bf16.msra.mxu0 %v821_v37  ;;  %576 = vmatprep.mubr.bf16.mxu0 %v839_v49 }
  0x24   :  { %536 = vmatmul.mubr.bf16.vlgmr.msra.gmra.mrb[0].mxu1 %v818_v35  ;;  %749 = vmatprep.subr.bf16.mxu0 %v822_v39 }
  0x25   :  { %773 = vmatprep.mubr.msk.bf16.mxu1 %vm866_vm0, %v865_v38  ;;  %772 = vmatpush3.bf16.msra.mxu1 %v836_v48 }
  0x27   :  { %750 = vmatpush3.bf16.msra.mxu0 %v823_v40 }
  0x28   :  { %751 = vmatprep.subr.bf16.mxu0 %v824_v41 }
  0x2b   :  { %752 = vmatpush3.bf16.msra.mxu0 %v825_v42 }
  0x2c   :  { %753 = vmatprep.subr.bf16.mxu0 %v826_v43  ;;  %774 = vmatmul.mubr.msk.bf16.vlgmr.msra.gmra.mrb[4].mxu1 %vm458_vm1, %v840_v51 }
  0x2f   :  { %754 = vmatpush3.bf16.msra.mxu0 %v827_v44 }
  0x30   :  { %755 = vmatprep.subr.bf16.mxu0 %v828_v45 }
  0x33   :  { %756 = vmatpush3.bf16.msra.mxu0 %v829_v46 }
  0x34   :  { %757 = vmatprep.subr.bf16.mxu0 %v830_v47 }
  0x37   :  { %758 = vmatpush3.bf16.msra.mxu0 %v831_v50 }
  0x38   :  { %759 = vmatprep.subr.bf16.mxu0 %v832_v52 }
  0x3b   :  { %760 = vmatpush3.bf16.msra.mxu0 %v833_v53 }
  0x3c   :  { %761 = vmatprep.subr.bf16.mxu0 %v834_v54 }
  0x3f   :  { %762 = vmatpush3.bf16.msra.mxu0 %v835_v55 }
  0x42   :  { %577 = vmatmul.mubr.bf16.vlgmr.msra.gmra.mrb[4].mxu0 %v837_v56 }
  0xf5   :  { %v719_v57 = vpop.f32.mrb[0].mxu0 }
  0xf6   :  { %v720_v59 = vpop.f32.mrb[1].mxu0 }
  0xf7   :  { %v721_v60 = vadd.f32 %v720_v59, %v719_v57  ;;  %v722_v61 = vpop.f32.mrb[2].mxu0  ;;  %v741_v62 = vpop.f32.mrb[0].mxu1 }
  0xf8   :  { %v723_v63 = vpop.f32.mrb[3].mxu0  ;;  %v742_v2 = vpop.f32.mrb[1].mxu1 }
  0xf9   :  { %v497_v0 = vadd.f32 %v721_v60, %v645_v58  ;;  %v724_v1 = vadd.f32 %v723_v63, %v722_v61  ;;  %v743_v3 = vadd.f32 %v742_v2, %v741_v62  ;;  %v744_v4 = vpop.f32.mrb[2].mxu1 }
  0xfa   :  { %v745_v6 = vpop.f32.mrb[3].mxu1 }
  0xfb   :  { %v500_v5 = vadd.f32 %v724_v1, %v645_v58  ;;  %v538_v7 = vadd.f32 %v743_v3, %v497_v0  ;;  %v746_v8 = vadd.f32 %v745_v6, %v744_v4 }
  0xfd   :  { %v541_v9 = vadd.f32 %v746_v8, %v500_v5 }
  0xff   :  { %v619_v10 = vpop.f32.mrb[4].mxu1 }
 0x100   :  { %v775_v11 = vpop.f32.mrb[5].mxu1 }
 0x101   :  { %v622_v12 = vpop.f32.mrb[6].mxu1 }
 0x102   :  { %v776_v13 = vpop.f32.mrb[7].mxu1 }
 0x115   :  { %v763_v14 = vpop.f32.mrb[4].mxu0 }
 0x116   :  { %v764_v15 = vpop.f32.mrb[5].mxu0 }
 0x117   :  { %v765_v16 = vadd.f32 %v764_v15, %v763_v14  ;;  %v766_v17 = vpop.f32.mrb[6].mxu0 }
 0x118   :  { %v767_v18 = vpop.f32.mrb[7].mxu0 }
 0x119   :  { %v579_v19 = vadd.f32 %v765_v16, %v538_v7  ;;  %v768_v20 = vadd.f32 %v767_v18, %v766_v17 }
 0x11b   :  { %v620_v21 = vadd.f32 %v619_v10, %v579_v19  ;;  %v582_v22 = vadd.f32 %v768_v20, %v541_v9 }
 0x11d   :  { %627 = vst.msk [vmem:[#allocation2] sm:$0xff] %vm626_vm2, %v620_v21  ;;  %v623_v23 = vadd.f32 %v622_v12, %v582_v22 }
 0x11f   :  { %628 = vst.msk [vmem:[#allocation2 + $0x8] sm:$0xff] %vm626_vm2, %v623_v23 }
 0x120   :  { %633 = vsyncadd [#allocation3], 128  ;;  %s867_s0 = smov [#allocation2]  }
 0x121   :  { %s634_s1 = sshll.u32 %s867_s0, 4  ;;  %s635_s1 = int_to_ptr.vmem [resolvable:$true] %s634_s1 }
 0x122   :  { %s841_s2 = scalar_lea.vmem %s635_s1, 128  ;;  %s845_s18 = scalar_lea.vmem %s635_s1, 256 }
 0x123   :  { %p842_p0 = scmp.ne.s32.totalorder %s635_s1, %s841_s2  ;;  %p846_p1 = scmp.lt.s32.totalorder %s635_s1, %s635_s1 }
 0x124   :  { %p847_p2 = scmp.lt.s32.totalorder %s845_s18, %s841_s2 }
 0x126   :  { %p848_p3 = por %p847_p2, %p846_p1 }
 0x128   :  { %p849_p4 = pnand %p848_p3, %p842_p0 }
 0x12a   :  { %852 = shalt.err (!%p849_p4)
}
 0x12b   :  { %s853_s21 = scalar_lea.hbm %s1076_s3, 128 }
 0x12c   :  { %p854_p5 = scmp.ne.s32.totalorder %s1076_s3, %s853_s21  ;;  %p857_p6 = scmp.lt.u32.totalorder %s853_s21, %s1076_s3 }
 0x12e   :  { %p859_p7 = pnand %p857_p6, %p854_p5 }
 0x130   :  { %862 = shalt.err (!%p859_p7)
}
 0x131   :  { %s868_s26 = smov 128   ;;  %s869_s27 = smov 8  }
 0x132   :  { %640 = dma.vmem_to_hbm [thread:$0]  %s635_s1, 128, %s1076_s3, [#allocation3], %s868_s26, %s868_s26, %s869_s27  }
 0x133   :  { %863 = dma.done.wait [#allocation3], 256  }
 0x134   :  { %864 = vsyncadd [#allocation3], 4294967040 }
 0x135   :  { %644 = vsyncpa [#allocation3], 1 }

</bundles_post_ra>
